<compile_context>
chip_gen: v6e
topology: v6e:2x2x1
jax: 0.10.0
libtpu: 0.0.40
codegen_flags: <defaults>
</compile_context>

<pallas_src>
import math

import jax
import jax.numpy as jnp
from jax.experimental import pallas as pl
from jax.experimental.pallas import tpu as pltpu


# ---------------------------------------------------------------------------
# Kernel
# ---------------------------------------------------------------------------

def _s2e_kernel(feat_ref, coeffs_ref, phase_ref, wt_ref, w01_ref, out_ref):
    # feat_ref:   (tn, 2)        columns: sign | logmag (caller dtype)
    # coeffs_ref: (1, K)         K = 2F + 8: [c_0..c_{F-1}, c_0..c_{F-1}, 0 x 8]
    # phase_ref:  (1, K)         [0 x F, -pi/2 x F, 0 x 8]
    # wt_ref:     (K, H)         [cos rows | sin rows | bias row | 0 x 7]
    # w01_ref:    (2, H)         projection rows for [sign, logmag]
    # out_ref:    (tn, H)        caller dtype
    sign = feat_ref[:, 0:1].astype(jnp.float32)                 # (tn, 1)
    logmag = feat_ref[:, 1:2].astype(jnp.float32)               # (tn, 1)
    ang = logmag * coeffs_ref[...] + phase_ref[...]             # (tn, K)
    trig = jnp.cos(ang)                                         # fused cos + sin + ones(bias)
    acc = jnp.dot(trig, wt_ref[...],
                  preferred_element_type=jnp.float32)           # (tn, H), bias included
    acc = acc + sign * w01_ref[0:1, :]
    acc = acc + logmag * w01_ref[1:2, :]
    out_ref[...] = acc.astype(out_ref.dtype)


# ---------------------------------------------------------------------------
# Wrapper helpers
# ---------------------------------------------------------------------------

def _vmem_capacity_bytes():
    try:
        cap = int(pltpu.get_tpu_info().vmem_capacity_bytes)
        if cap > 0:
            return cap
    except Exception:
        pass
    return 128 * 1024 * 1024  # conservative fallback (v5e/v6e)


def _sublane_align(dtype):
    # f32 -> 8, bf16/f16 -> 16, int8/fp8 -> 32 (sublane packing of the row tile).
    bits = jnp.dtype(dtype).itemsize * 8
    return max(8, 256 // bits)


def _pick_tile_n(n, hidden, feat_dim, align, out_bytes, in_bytes,
                 budget_bytes, max_tile=8192):
    """Largest `align`-multiple row tile whose per-step VMEM footprint fits the budget.

    Counts double-buffered in/out blocks plus the (tn, 2F+8) f32 ang/trig intermediates
    and the f32 accumulator. Prefers >= 2 grid steps, and an EVEN step count when the
    step count is small so both v7x TensorCores get balanced work."""
    if n <= align:
        return int(n)  # single block equal to the full (tiny) row extent
    k_ext = 2 * feat_dim + 8
    per_row = (2 * out_bytes * hidden   # double-buffered output block
               + 2 * in_bytes * 2       # double-buffered feat block
               + 8 * k_ext              # ang + trig f32 intermediates
               + 4 * hidden)            # f32 accumulator before the output cast
    t = (budget_bytes // per_row) // align * align
    t = max(align, min(max_tile, int(t)))
    if t >= n:                          # avoid a 1-step grid: split into ~2 blocks
        half = (n + 1) // 2
        t = ((half + align - 1) // align) * align
    steps = -(-n // t)
    if 1 < steps < 16 and steps % 2 == 1:
        t_even = ((-(-n // (steps + 1)) + align - 1) // align) * align
        if t_even >= align and (-(-n // t_even)) % 2 == 0:
            t = t_even
    return int(t)


# ---------------------------------------------------------------------------
# Wrapper
# ---------------------------------------------------------------------------

def scalar_to_embed(feat, weight, bias, *, sigma=1.0, feat_dim=32, tile_n=None):
    """feat: (..., 2) [sign, logmag].  weight: (2*feat_dim+2, hidden) with rows ordered
    [sign, logmag, cos_0..cos_{F-1}, sin_0..sin_{F-1}] (i.e. torch Linear weight.T).
    bias: (hidden,).  Output dtype matches feat.dtype."""
    *lead, two = feat.shape
    assert two == 2, "last dim of feat must be 2 (sign, logmag)"
    hidden = int(weight.shape[1])
    assert int(weight.shape[0]) == 2 * feat_dim + 2
    out_dtype = feat.dtype

    n = 1
    for d in lead:
        n *= int(d)
    feat2d = feat.reshape(n, 2)                      # native dtype; view, no copy

    # Fused Fourier table, widened by 8 columns:
    #   trig = cos(logmag * coeffs + phase); sin(x) = cos(x - pi/2);
    #   column 2F has coeff=0, phase=0 -> cos == 1 -> carries the bias through the matmul;
    #   columns 2F+1..2F+7 are padding (weight rows are zero -> contribute exactly 0).
    F = feat_dim
    k_ext = 2 * F + 8
    j = jnp.arange(F, dtype=jnp.float32)
    c = 2.0 * math.pi * (sigma ** (j / F))
    coeffs = jnp.concatenate(
        [c, c, jnp.zeros((8,), jnp.float32)]).reshape(1, k_ext)
    phase = jnp.concatenate(
        [jnp.zeros((F,), jnp.float32),
         jnp.full((F,), -0.5 * math.pi, jnp.float32),
         jnp.zeros((8,), jnp.float32)]).reshape(1, k_ext)

    w01 = weight[0:2, :].astype(jnp.float32)                     # (2, H)  sign / logmag rows
    wt_ext = jnp.concatenate(
        [weight[2:, :].astype(jnp.float32),                      # (2F, H) [cos rows | sin rows]
         bias.reshape(1, hidden).astype(jnp.float32),            # bias row (ones column)
         jnp.zeros((7, hidden), jnp.float32)], axis=0)           # padding rows

    # Generation-aware VMEM budgeting (128 MiB on v5e/v6e, 64 MiB per-TC on v7x).
    vmem_cap = _vmem_capacity_bytes()
    vmem_limit = (vmem_cap * 3) // 4
    budget = vmem_limit // 2

    align = _sublane_align(out_dtype)
    itemsize = jnp.dtype(out_dtype).itemsize
    if tile_n is not None:
        tn = int(tile_n)
    else:
        tn = _pick_tile_n(n, hidden, F, align, itemsize,
                          jnp.dtype(feat.dtype).itemsize, budget)
    grid = (pl.cdiv(n, tn),)

    out = pl.pallas_call(
        _s2e_kernel,
        out_shape=jax.ShapeDtypeStruct((n, hidden), out_dtype),
        grid_spec=pltpu.PrefetchScalarGridSpec(
            num_scalar_prefetch=0,
            grid=grid,
            in_specs=[
                pl.BlockSpec((tn, 2), lambda i: (i, 0)),
                pl.BlockSpec((1, k_ext), lambda i: (0, 0)),
                pl.BlockSpec((1, k_ext), lambda i: (0, 0)),
                pl.BlockSpec((k_ext, hidden), lambda i: (0, 0)),
                pl.BlockSpec((2, hidden), lambda i: (0, 0)),
            ],
            out_specs=pl.BlockSpec((tn, hidden), lambda i: (i, 0)),
        ),
        compiler_params=pltpu.CompilerParams(
            dimension_semantics=("parallel",),
            vmem_limit_bytes=int(vmem_limit),
        ),
    )(feat2d, coeffs, phase, wt_ext, w01)

    return out.reshape(*lead, hidden)


# ---------------------------------------------------------------------------
# Pure-JAX reference (matches the PyTorch module)
# ---------------------------------------------------------------------------

def _reference(feat, weight, bias, *, sigma=1.0, feat_dim=32):
    sign = feat[..., 0:1].astype(jnp.float32)
    logmag = feat[..., 1:2].astype(jnp.float32)
    j = jnp.arange(feat_dim, dtype=jnp.float32)
    coeffs = 2.0 * math.pi * (sigma ** (j / feat_dim))
    vp = logmag * coeffs                                       # (..., F)
    trig = jnp.concatenate([jnp.cos(vp), jnp.sin(vp)], axis=-1)
    concat = jnp.concatenate([sign, logmag, trig], axis=-1)
    return jnp.dot(concat, weight.astype(jnp.float32),
                   precision=jax.lax.Precision.HIGHEST) + bias.astype(jnp.float32)


if __name__ == "__main__":
    # Primary demo: (B, S) = (2, 8), hidden = 32, feat_dim = 32.
    B, S = 2, 8
    hidden = 32
    feat_dim = 32
    sigma = 1.0
    in_dim = 2 * feat_dim + 2

    key = jax.random.PRNGKey(0)
    k_feat, k_w, k_b = jax.random.split(key, 3)

    sign = jnp.sign(jax.random.normal(k_feat, (B, S, 1), dtype=jnp.float32))
    logmag = jax.random.normal(jax.random.fold_in(k_feat, 1), (B, S, 1), dtype=jnp.float32)
    feat = jnp.concatenate([sign, logmag], axis=-1)

    bound = 1.0 / math.sqrt(in_dim)
    weight = jax.random.uniform(k_w, (in_dim, hidden), jnp.float32, -bound, bound)
    bias = jax.random.uniform(k_b, (hidden,), jnp.float32, -bound, bound)

    out = scalar_to_embed(feat, weight, bias, sigma=sigma, feat_dim=feat_dim)
    out = jax.block_until_ready(out)
    ref = _reference(feat, weight, bias, sigma=sigma, feat_dim=feat_dim)
    assert out.shape == (B, S, hidden)
    assert out.dtype == feat.dtype
    err = float(jnp.max(jnp.abs(out.astype(jnp.float32) - ref)))
    assert err < 1e-4, err

    # Secondary checks: small/large hidden, non-divisible tail block, bf16 output path.
    def _check(lead_shape, hidden2, sigma2, fd2, seed, dtype=jnp.float32, tol=1e-4):
        k = jax.random.PRNGKey(seed)
        kf, kw, kb = jax.random.split(k, 3)
        f = jax.random.normal(kf, (*lead_shape, 2), dtype=jnp.float32)
        f = f.at[..., 0].set(jnp.sign(f[..., 0])).astype(dtype)
        ind = 2 * fd2 + 2
        bnd = 1.0 / math.sqrt(ind)
        w = jax.random.uniform(kw, (ind, hidden2), jnp.float32, -bnd, bnd)
        bb = jax.random.uniform(kb, (hidden2,), jnp.float32, -bnd, bnd)
        o = jax.block_until_ready(scalar_to_embed(f, w, bb, sigma=sigma2, feat_dim=fd2))
        r = _reference(f, w, bb, sigma=sigma2, feat_dim=fd2)
        assert o.shape == (*lead_shape, hidden2)
        assert o.dtype == dtype
        e = float(jnp.max(jnp.abs(o.astype(jnp.float32) - r)))
        assert e < tol, e

    _check((200,), 32, 1.0, 32, 1)                              # small H, partial tail block
    _check((210,), 256, 2.0, 32, 2)                             # large H, partial tail block
    _check((300,), 64, 1.0, 32, 3, dtype=jnp.bfloat16, tol=5e-2)  # bf16 in/out path

    print("KERNEL_OK")
</pallas_src>

<mosaic_0001>
module attributes {stable_mosaic.version = 11 : i64} {
  func.func @_s2e_kernel(%arg0: i32, %arg1: memref<8x2xf32, #tpu.memory_space<vmem>>, %arg2: memref<1x72xf32, #tpu.memory_space<vmem>>, %arg3: memref<1x72xf32, #tpu.memory_space<vmem>>, %arg4: memref<72x32xf32, #tpu.memory_space<vmem>>, %arg5: memref<2x32xf32, #tpu.memory_space<vmem>>, %arg6: memref<8x32xf32, #tpu.memory_space<vmem>>) attributes {dimension_semantics = [#tpu.dimension_semantics<parallel>], iteration_bounds = array<i64: 2>, scalar_prefetch = 0 : i64, scratch_operands = 0 : i64, tpu.core_type = #tpu.core_type<tc>, window_params = [{transform_indices = @transform_0, window_bounds = array<i64: 8, 2>}, {pipeline_mode = #tpu.pipeline_mode<synchronous>, transform_indices = @transform_1, window_bounds = array<i64: 1, 72>}, {pipeline_mode = #tpu.pipeline_mode<synchronous>, transform_indices = @transform_2, window_bounds = array<i64: 1, 72>}, {pipeline_mode = #tpu.pipeline_mode<synchronous>, transform_indices = @transform_3, window_bounds = array<i64: 72, 32>}, {pipeline_mode = #tpu.pipeline_mode<synchronous>, transform_indices = @transform_4, window_bounds = array<i64: 2, 32>}, {transform_indices = @transform_5, window_bounds = array<i64: 8, 32>}]} {
    %c0 = arith.constant 0 : index
    %c0_0 = arith.constant 0 : index
    %0 = vector.load %arg1[%c0, %c0_0] : memref<8x2xf32, #tpu.memory_space<vmem>>, vector<8x1xf32>
    %c0_1 = arith.constant 0 : index
    %c1 = arith.constant 1 : index
    %1 = vector.load %arg1[%c0_1, %c1] : memref<8x2xf32, #tpu.memory_space<vmem>>, vector<8x1xf32>
    %c0_2 = arith.constant 0 : index
    %c0_3 = arith.constant 0 : index
    %2 = vector.load %arg2[%c0_2, %c0_3] : memref<1x72xf32, #tpu.memory_space<vmem>>, vector<1x72xf32>
    %3 = vector.broadcast %1 : vector<8x1xf32> to vector<8x72xf32>
    %4 = vector.broadcast %2 : vector<1x72xf32> to vector<8x72xf32>
    %5 = arith.mulf %3, %4 : vector<8x72xf32>
    %c0_4 = arith.constant 0 : index
    %c0_5 = arith.constant 0 : index
    %6 = vector.load %arg3[%c0_4, %c0_5] : memref<1x72xf32, #tpu.memory_space<vmem>>, vector<1x72xf32>
    %7 = vector.broadcast %6 : vector<1x72xf32> to vector<8x72xf32>
    %8 = arith.addf %5, %7 : vector<8x72xf32>
    %9 = math.cos %8 : vector<8x72xf32>
    %c0_6 = arith.constant 0 : index
    %c0_7 = arith.constant 0 : index
    %10 = vector.load %arg4[%c0_6, %c0_7] : memref<72x32xf32, #tpu.memory_space<vmem>>, vector<72x32xf32>
    %cst = arith.constant dense<0.000000e+00> : vector<8x32xf32>
    %11 = tpu.matmul %9, %10, %cst {dimension_numbers = #tpu.dot_dimension_numbers<[1], [0], [0], [1], [0, 0, 1, 1], [], []>} : vector<8x72xf32>, vector<72x32xf32>, vector<8x32xf32> -> vector<8x32xf32>
    %c0_8 = arith.constant 0 : index
    %c0_9 = arith.constant 0 : index
    %12 = vector.load %arg5[%c0_8, %c0_9] : memref<2x32xf32, #tpu.memory_space<vmem>>, vector<1x32xf32>
    %13 = vector.broadcast %0 : vector<8x1xf32> to vector<8x32xf32>
    %14 = vector.broadcast %12 : vector<1x32xf32> to vector<8x32xf32>
    %15 = arith.mulf %13, %14 : vector<8x32xf32>
    %16 = arith.addf %11, %15 : vector<8x32xf32>
    %c1_10 = arith.constant 1 : index
    %c0_11 = arith.constant 0 : index
    %17 = vector.load %arg5[%c1_10, %c0_11] : memref<2x32xf32, #tpu.memory_space<vmem>>, vector<1x32xf32>
    %18 = vector.broadcast %1 : vector<8x1xf32> to vector<8x32xf32>
    %19 = vector.broadcast %17 : vector<1x32xf32> to vector<8x32xf32>
    %20 = arith.mulf %18, %19 : vector<8x32xf32>
    %21 = arith.addf %16, %20 : vector<8x32xf32>
    %c0_12 = arith.constant 0 : index
    %c0_13 = arith.constant 0 : index
    %22 = vector.load %arg6[%c0_12, %c0_13] : memref<8x32xf32, #tpu.memory_space<vmem>>, vector<8x32xf32>
    tpu.vector_store %arg6[%c0_12, %c0_13], %21 {strides = array<i32>} : memref<8x32xf32, #tpu.memory_space<vmem>>, vector<8x32xf32>,
    return
  }
  func.func @transform_0(%arg0: i32) -> (i32, i32) {
    %c0_i32 = arith.constant 0 : i32
    %c0_i32_0 = arith.constant 0 : i32
    return %arg0, %c0_i32 : i32, i32
  }
  func.func @transform_1(%arg0: i32) -> (i32, i32) {
    %c0_i32 = arith.constant 0 : i32
    %c0_i32_0 = arith.constant 0 : i32
    %c0_i32_1 = arith.constant 0 : i32
    return %c0_i32, %c0_i32_0 : i32, i32
  }
  func.func @transform_2(%arg0: i32) -> (i32, i32) {
    %c0_i32 = arith.constant 0 : i32
    %c0_i32_0 = arith.constant 0 : i32
    %c0_i32_1 = arith.constant 0 : i32
    return %c0_i32, %c0_i32_0 : i32, i32
  }
  func.func @transform_3(%arg0: i32) -> (i32, i32) {
    %c0_i32 = arith.constant 0 : i32
    %c0_i32_0 = arith.constant 0 : i32
    %c0_i32_1 = arith.constant 0 : i32
    return %c0_i32, %c0_i32_0 : i32, i32
  }
  func.func @transform_4(%arg0: i32) -> (i32, i32) {
    %c0_i32 = arith.constant 0 : i32
    %c0_i32_0 = arith.constant 0 : i32
    %c0_i32_1 = arith.constant 0 : i32
    return %c0_i32, %c0_i32_0 : i32, i32
  }
  func.func @transform_5(%arg0: i32) -> (i32, i32) {
    %c0_i32 = arith.constant 0 : i32
    %c0_i32_0 = arith.constant 0 : i32
    return %arg0, %c0_i32 : i32, i32
  }
}

</mosaic_0001>

<bundles_post_ra>
// kernel: tpu_custom_call.1
= control target key start
LH: loop header
LB: loop body
LE: loop exit
PB: predicated region body
PF: predicated region fallthrough
CT: control target
= control target key end

     0   :  { %10 = vsyncpa [#allocation3], 0  ;;  %s883_s0 = inlined_call_operand.vmem [shape: f32[16,2], index: 0, kind: input, shape index: {}]   ;;  %s884_s1 = inlined_call_operand.vmem [shape: f32[1,72], index: 1, kind: input, shape index: {}]   ;;  %s885_s2 = inlined_call_operand.vmem [shape: f32[1,72], index: 2, kind: input, shape index: {}]   ;;  %s886_s3 = inlined_call_operand.vmem [shape: f32[72,32], index: 3, kind: input, shape index: {}]   ;;  %s887_s4 = inlined_call_operand.vmem [shape: f32[2,32], index: 4, kind: input, shape index: {}]   ;;  %s888_s5 = inlined_call_operand.hbm [shape: f32[16,32], index: 5, kind: output, shape index: {}]  }
   0x1   :  { %12 = vsyncpa [#allocation3 + $0x1], 0  ;;  %s732_s18 = smov 0   ;;  %s734_s19 = smov 0  }
   0x2   :  { %s736_s20 = smov 0   ;;  %s738_s21 = smov 0  }
   0x3 LB: > { %s753_s22 = sadd.s32 4294967295, %s689_s21   ;;  %s520_s23 = sadd.s32 4294967294, %s689_s21   ;;  %s689_s21 = sphi %s738_s21, %s894_s21   ;;  %s685_s20 = sphi %s736_s20, %s893_s20   ;;  %s681_s19 = sphi %s734_s19, %s892_s19   ;;  %s677_s18 = sphi %s732_s18, %s891_s18  }
   0x4   : > { %s757_s24 = sadd.s32 1, %s689_s21   ;;  %s135_s25 = sadd.s32 1, %s685_s20 }
   0x5   : > { %s132_s26 = ssub.s32 %s689_s21, %s757_s24  ;;  %p145_p0 = scmp.ne.s32.totalorder %s685_s20, %s681_s19 }
   0x6   : > { %p133_p1 = scmp.eq.s32.totalorder %s132_s26, 0  ;;  %p146_p2 = scmp.eq.s32.totalorder %s753_s22, 1 }
   0x7   : > { %p151_p3 = scmp.ne.s32.totalorder %s681_s19, %s677_s18  ;;  %p152_p4 = scmp.eq.s32.totalorder %s520_s23, 1 }
   0x8   : > { %s768_s27 = scalar_select %p133_p1, %s685_s20, %s135_s25  }
   0x9   : > { %p770_p5 = por %p146_p2, %p145_p0  ;;  %p774_p6 = por %p152_p4, %p151_p3 }
   0xa   : > { %p523_p7 = scmp.ge.s32.totalorder %s689_s21, 1  ;;  %p189_p8 = scmp.lt.s32.totalorder %s689_s21, 3 }
   0xc   : > { %p190_p9 = pnand %p523_p7, %p189_p8 }
   0xd   : > { %p216_p10 = scmp.lt.s32.totalorder (!%p190_p9), %s753_s22, 1  ;;  %s213_s16 = sand.u32 (!%p190_p9), 1, %s681_s19  }
   0xe   : > { %193 = sbr.rel (%p190_p9) target bundleno = 444 (0x1bc), region = 40  ;;  %s524_s25 = sshll.u32 (!%p190_p9), %s213_s16, 3 }
   0xf   : > { %s215_s7 = scalar_lea.vmem (!%p190_p9), [#allocation2], %s524_s25  ;;  %s448_s12 = scalar_lea.sflag (!%p190_p9), [#allocation3], %s213_s16 }
  0x10   : > { %s461_s8 = sshll.u32 (!%p190_p9), %s215_s7, 4  ;;  %s462_s8 = int_to_ptr.vmem [resolvable:$true] %s461_s8 }
  0x11   : > { %s629_s13 = scalar_lea.vmem (!%p190_p9), %s462_s8, 128 }
  0x12   : > { %p630_p11 = scmp.ne.s32.totalorder (!%p190_p9), %s462_s8, %s629_s13 }
  0x13   : > { %v691_v0 = vmov 1   ;;  %s217_s30 = scalar_select %p216_p10, %s753_s22, 1  ;;  %v353_v2 = vld [vmem:[%s886_s3 + $0x40] sm:$0xff]  ;;  %v692_v3 = vmov 0.0   ;;  %v352_v4 = vld [vmem:[%s886_s3 + $0x38] sm:$0xff]  ;;  %vm693_vm0 = vmmov 0  }
  0x14   : > { %623 = vset.pattern.permute.xlu0 %v691_v0  ;;  %549 = vmatprep.subr.mxu0 %v692_v3  ;;  %v351_v5 = vld [vmem:[%s886_s3 + $0x30] sm:$0xff]  ;;  %v350_v6 = vld [vmem:[%s886_s3 + $0x28] sm:$0xff]  ;;  %v349_v7 = vld [vmem:[%s886_s3 + $0x20] sm:$0xff]  ;;  %v694_v12 = vmov 0   ;;  %v695_v29 = vmov 2102212464   ;;  %p631_p12 = pnand %p630_p11, %p770_p5 }
  0x15   : > { %s525_s6 = sshll.u32 %s217_s30, 3  ;;  %567 = vmatprep.mubr.msk.f32.mxu0 %vm693_vm0, %v692_v3  ;;  %550 = vmatpush3.msra.mxu0 %v353_v2  ;;  %v348_v8 = vld [vmem:[%s886_s3 + $0x18] sm:$0xff]  ;;  %v347_v9 = vld [vmem:[%s886_s3 + $0x10] sm:$0xff]  ;;  %v346_v10 = vld [vmem:[%s886_s3 + $0x8] sm:$0xff]  ;;  %v696_v31 = vmov 920167782  }
  0x16   : > { %s219_s9 = scalar_lea.vmem %s883_s0, %s525_s6  ;;  %551 = vmatprep.subr.mxu0 %v692_v3  ;;  %v345_v11 = vld [vmem:[%s886_s3] sm:$0xff]  ;;  %v697_v35 = vmov 1326507024   ;;  %v698_v37 = vmov 683565275   ;;  %vm364_vm13 = vcmask 588800   ;;  %p632_p13 = pneg %p631_p12 }
  0x17   : > { %v220_v1 = vld [vmem:[%s219_s9] sm:$0xff]  ;;  %552 = vmatpush3.msra.mxu0 %v352_v4  ;;  %v699_v39 = vmov 2475754826   ;;  %v700_v42 = vmov 2131351028   ;;  %s536_s6 = sshll.u32 %s753_s22, 7 }
  0x18   : > { %224 = vperm.xlu0 %623, %v220_v1   ;;  %553 = vmatprep.subr.mxu0 %v692_v3  ;;  %v526_v13 = vld [vmem:[%s884_s1] ss:$0 sm:$0xff]  ;;  %vm445_vm15 = vcmask 261120   ;;  %s459_s11 = scalar_lea.hbm %s888_s5, %s536_s6  ;;  %s701_s22 = smov [#allocation2]  }
  0x19   : > { %554 = vmatpush3.msra.mxu0 %v351_v5  ;;  %v527_v14 = vld [vmem:[%s885_s2] ss:$0 sm:$0xff]  ;;  %s633_s14 = sshll.u32 %s701_s22, 4  ;;  %s634_s14 = int_to_ptr.vmem [resolvable:$false] %s633_s14 }
  0x1a   : > { %555 = vmatprep.subr.mxu0 %v692_v3  ;;  %s635_s15 = scalar_lea.vmem %s634_s14, 256  ;;  %p636_p0 = scmp.lt.s32.totalorder %s462_s8, %s634_s14 }
  0x1b   : > { %556 = vmatpush3.msra.mxu0 %v350_v6  ;;  %p637_p1 = scmp.lt.s32.totalorder %s635_s15, %s629_s13 }
  0x1c   : > { %557 = vmatprep.subr.mxu0 %v692_v3  ;;  %624 = vset.pattern.permute.xlu0 %v694_v12 }
  0x1d   : > { %558 = vmatpush3.msra.mxu0 %v349_v7  ;;  %356 = vperm.xlu0 %624, %v220_v1   ;;  %p638_p2 = por %p637_p1, %p636_p0 }
  0x1e   : > { %559 = vmatprep.subr.mxu0 %v692_v3 }
  0x1f   : > { %560 = vmatpush3.msra.mxu0 %v348_v8  ;;  %p639_p3 = pnand %p638_p2, %p632_p13 }
  0x20   : > { %561 = vmatprep.subr.mxu0 %v692_v3 }
  0x21   : > { %562 = vmatpush3.msra.mxu0 %v347_v9 }
  0x22   : > { %563 = vmatprep.subr.mxu0 %v692_v3 }
  0x23   : > { %564 = vmatpush3.msra.mxu0 %v346_v10 }
  0x24   : > { %565 = vmatprep.subr.mxu0 %v692_v3 }
  0x25   : > { %566 = vmatpush3.msra.mxu0 %v345_v11 }
  0x93   : > { %v818_v15 = vpop.permute.xlu0 %224 }
  0x94   : > { %v233_v16 = vmul.f32 %v526_v13, %v818_v15 }
  0x96   : > { %v821_v17 = vadd.f32 %v527_v14, %v233_v16 }
  0x98   : > { %v245_v18 = vand.u32 2139095040, %v821_v17  ;;  %v242_v19 = vand.u32 2147483647, %v821_v17  ;;  %vm244_vm8 = vcmp.lt.s32.totalorder %v821_v17, 0  ;;  %vm334_vm14 = vweird.f32 %v821_v17 }
  0x9a   : > { %v246_v20 = vshrl.u32 %v245_v18, 23  ;;  %v249_v22 = vand.u32 8388607, %v242_v19  ;;  %vm243_vm9 = vcmp.le.f32.partialorder %v242_v19, 0.7853982 }
  0x9c   : > { %v528_v21 = vadd.s32 4294967169, %v246_v20  ;;  %v250_v25 = vor.u32 8388608, %v249_v22 }
  0x9e   : > { %v252_v23 = vadd.s32 1, %v528_v21  ;;  %v290_v33 = vshll.u32 %v250_v25, 8 }
  0xa0   : > { %vm253_vm1 = vcmp.gt.s32.totalorder %v252_v23, 0 }
  0xa1   : > { %v254_v24 = vsel %vm253_vm1, %v252_v23, 0 }
  0xa2   : > { %v256_v26 = vand.u32 31, %v254_v24  ;;  %v255_v27 = vshrl.u32 %v254_v24, 5 }
  0xa4   : > { %v257_v28 = vsub.s32 32, %v256_v26  ;;  %v268_v30 = vshll.u32 %v695_v29, %v256_v26  ;;  %v271_v32 = vshll.u32 %v696_v31, %v256_v26  ;;  %v259_v38 = vshll.u32 %v698_v37, %v256_v26 }
  0xa5   : > { %v262_v41 = vshll.u32 %v699_v39, %v256_v26  ;;  %v265_v44 = vshll.u32 %v700_v42, %v256_v26  ;;  %vm277_vm2 = vcmp.lt.s32.totalorder %v255_v27, 4  ;;  %vm274_vm3 = vcmp.lt.s32.totalorder %v255_v27, 1 }
  0xa6   : > { %v269_v34 = vshrl.u32 %v696_v31, %v257_v28  ;;  %v272_v36 = vshrl.u32 %v697_v35, %v257_v28  ;;  %v260_v40 = vshrl.u32 %v699_v39, %v257_v28  ;;  %v263_v43 = vshrl.u32 %v700_v42, %v257_v28 }
  0xa7   : > { %v266_v45 = vshrl.u32 %v695_v29, %v257_v28  ;;  %v258_v49 = vshrl.u32 %v698_v37, %v257_v28  ;;  %vm275_vm4 = vcmp.lt.s32.totalorder %v255_v27, 2  ;;  %vm276_vm5 = vcmp.lt.s32.totalorder %v255_v27, 3 }
  0xa8   : > { %v270_v46 = vor.u32 %v269_v34, %v268_v30  ;;  %v273_v47 = vor.u32 %v272_v36, %v271_v32  ;;  %v261_v48 = vor.u32 %v260_v40, %v259_v38  ;;  %v264_v50 = vor.u32 %v263_v43, %v262_v41 }
  0xa9   : > { %v267_v51 = vor.u32 %v266_v45, %v265_v44 }
  0xaa   : > { %v283_v52 = vsel %vm277_vm2, %v270_v46, 920167782  ;;  %v287_v53 = vsel %vm277_vm2, %v273_v47, 1326507024  ;;  %v282_v55 = vsel %vm274_vm3, %v261_v48, %v264_v50  ;;  %v278_v58 = vsel %vm274_vm3, %v258_v49, %v261_v48  ;;  %v357_v47 = vpop.permute.xlu0 %356  ;;  %v534_v49 = vld [vmem:[%s887_s4 + $0x1] ss:$0 sm:$0xff] }
  0xab   : > { %v279_v54 = vsel %vm277_vm2, %v267_v51, 2102212464  ;;  %v284_v56 = vsel %vm276_vm5, %v267_v51, %v283_v52  ;;  %v286_v57 = vsel %vm274_vm3, %v264_v50, %v267_v51  ;;  %v288_v61 = vsel %vm276_vm5, %v270_v46, %v287_v53  ;;  %v532_v46 = vld [vmem:[%s887_s4] ss:$0 sm:$0xff] }
  0xac   : > { %v280_v59 = vsel %vm276_vm5, %v264_v50, %v279_v54  ;;  %v285_v60 = vsel %vm275_vm4, %v282_v55, %v284_v56  ;;  %v289_v62 = vsel %vm275_vm4, %v286_v57, %v288_v61  ;;  %v363_v48 = vmul.f32 %v532_v46, %v357_v47 }
  0xad   : > { %v827_v63 = vmul.u32.u64.low %v290_v33, %v285_v60  ;;  %v828_v0 = vmul.u32.u64.high %v290_v33, %v285_v60, %v827_v63  ;;  %v830_v1 = vmul.u32.u64.low %v290_v33, %v289_v62  ;;  %v831_v2 = vmul.u32.u64.high %v290_v33, %v289_v62, %v830_v1 }
  0xae   : > { %v281_v3 = vsel %vm275_vm4, %v278_v58, %v280_v59 }
  0xaf   : > { %v300_v4 = vadd.s32 1, %v828_v0  ;;  %v297_v5 = vmul.u32 %v290_v33, %v281_v3  ;;  %vm299_vm6 = vc.u32 %v831_v2, %v827_v63  ;;  %v298_v20 = vadd.s32 %v827_v63, %v831_v2 }
  0xb1   : > { %v301_v6 = vsel %vm299_vm6, %v300_v4, %v828_v0 }
  0xb2   : > { %v302_v7 = vadd.s32 %v301_v6, %v297_v5 }
  0xb4   : > { %v303_v8 = vadd.s32 536870912, %v302_v7 }
  0xb6   : > { %v304_v9 = vshrl.u32 %v303_v8, 30 }
  0xb8   : > { %v305_v10 = vshll.u32 %v304_v9, 30  ;;  %v328_v35 = vsub.s32 4, %v304_v9 }
  0xba   : > { %v306_v11 = vsub.s32 %v302_v7, %v305_v10  ;;  %v329_v36 = vsel %vm244_vm8, %v328_v35, %v304_v9 }
  0xbb   : > { %v331_v37 = vsel %vm243_vm9, 0, %v329_v36 }
  0xbc   : > { %v308_v12 = vsub.s32 0, %v306_v11  ;;  %v335_v38 = vand.u32 3, %v331_v37 }
  0xbe   : > { %v529_v13 = vmin.u32 %v308_v12, %v306_v11  ;;  %vm340_vm10 = vcmp.eq.s32.totalorder %v335_v38, 2  ;;  %vm337_vm11 = vcmp.eq.s32.totalorder %v335_v38, 0  ;;  %vm336_vm12 = vcmp.lt.s32.totalorder %v335_v38, 2 }
  0xc0   : > { %v310_v14 = vclz %v529_v13 }
  0xc2   : > { %v530_v16 = vadd.s32 4294967294, %v310_v14 }
  0xc4   : > { %vm531_vm7 = vcmp.lt.s32.totalorder %v530_v16, 0 }
  0xc5   : > { %v313_v18 = vsel %vm531_vm7, 0, %v530_v16 }
  0xc6   : > { %v314_v21 = vsub.s32 32, %v313_v18  ;;  %v318_v22 = vsub.s32 4294967266, %v313_v18  ;;  %v315_v23 = vshll.u32 %v306_v11, %v313_v18 }
  0xc8   : > { %v316_v24 = vshrl.u32 %v298_v20, %v314_v21  ;;  %v319_v25 = vadd.s32 127, %v318_v22 }
  0xca   : > { %v317_v26 = vor.u32 %v316_v24, %v315_v23  ;;  %v320_v27 = vshll.u32 %v319_v25, 23 }
  0xcc   : > { %v321_v28 = vor.u32 4788187, %v320_v27  ;;  %v324_v30 = vcvt.s32.f32 %v317_v26 }
  0xce   : > { %v322_v29 = vand.u32 2147483647, %v321_v28 }
  0xd0   : > { %v325_v31 = vmul.f32 %v324_v30, %v322_v29 }
  0xd2   : > { %v326_v32 = vxor.u32 2147483648, %v325_v31 }
  0xd4   : > { %v327_v33 = vsel %vm244_vm8, %v326_v32, %v325_v31 }
  0xd5   : > { %v330_v34 = vsel %vm243_vm9, %v821_v17, %v327_v33  ;;  %v443_v17 = vmul.f32 %v534_v49, %v818_v15 }
  0xd6   : > { %625 = vcosq.f32 %v330_v34 }
  0xd7   : > { %627 = vsinq.f32 %v330_v34 }
  0xe3   : > { %v626_v39 = vpop.eup %625 }
  0xe4   : > { %v628_v40 = vpop.eup %627  ;;  %v341_v41 = vxor.u32 2147483648, %v626_v39 }
  0xe5   : > { %v338_v42 = vxor.u32 2147483648, %v628_v40 }
  0xe6   : > { %v342_v43 = vsel %vm340_vm10, %v341_v41, %v628_v40 }
  0xe7   : > { %v339_v19 = vsel %vm337_vm11, %v626_v39, %v338_v42 }
  0xe8   : > { %v343_v44 = vsel %vm336_vm12, %v339_v19, %v342_v43 }
  0xe9   : > { %v344_v45 = vsel %vm334_vm14, nan, %v343_v44 }
  0xea   : > { %568 = vmatmul.mubr.msk.f32.vlgmr.msra.gmra.mxu0 %vm364_vm13, %v344_v45 }
 0x1aa   : > { %v434_v50 = vpop.f32.mrf.mxu0 }
 0x1ab   : > { %v435_v51 = vadd.f32 %v434_v50, %v363_v48 }
 0x1ac   : > { %v569_v52 = vpop.f32.mrf.mxu0 }
 0x1ad   : > { %v444_v53 = vadd.f32 %v443_v17, %v435_v51 }
 0x1af   : > { %446 = vst.msk [vmem:[%s215_s7] sm:$0xff] %vm445_vm15, %v444_v53 }
 0x1b0   : > { %642 = shalt.err (!%p639_p3)
}
 0x1b1   : > { %s643_s17 = scalar_lea.hbm %s459_s11, 128  ;;  %s647_s25 = scalar_lea.hbm %s888_s5, 256 }
 0x1b2   : > { %p644_p4 = scmp.ne.s32.totalorder %s459_s11, %s643_s17  ;;  %p648_p9 = scmp.lt.s32.totalorder %s459_s11, %s888_s5 }
 0x1b3   : > { %p649_p10 = scmp.lt.s32.totalorder %s647_s25, %s643_s17 }
 0x1b4   : > { %p645_p7 = pnand %p644_p4, %p770_p5 }
 0x1b5   : > { %p650_p11 = por %p649_p10, %p648_p9 }
 0x1b6   : > { %p646_p8 = pneg %p645_p7 }
 0x1b8   : > { %p651_p12 = pnand %p650_p11, %p646_p8 }
 0x1ba   : > { %654 = shalt.err (!%p651_p12)
}
 0x1bb   : > { %574 = dma.vmem_to_hbm [thread:$0]  (%p770_p5), %s462_s8, 128, %s459_s11, %s448_s12  }
 0x1bc PF: > { %p580_p13 = scmp.ge.s32.totalorder %s689_s21, 2  ;;  %s473_s6 = sand.u32 1, %s677_s18  }
 0x1bd   : > { %s474_s7 = scalar_lea.sflag [#allocation3], %s473_s6 }
 0x1be   : > { %p577_p0 = pnand %p580_p13, %p774_p6 }
 0x1c0   : > { %p578_p1 = pneg %p577_p0 }
 0x1c2   : > { %672 = dma.done.wait (%p578_p1), %s474_s7, 128  }
 0x1c3   : > { %674 = vsyncadd (%p578_p1), %s474_s7, 4294967168  ;;  %p15_p2 = scmp.ge.s32.totalorder %s757_s24, 4   ;;  %s891_s18 = smov %s681_s19 }
 0x1c4   : > { %s892_s19 = smov %s685_s20  ;;  %s893_s20 = smov %s768_s27 }
 0x1c5   : > { %s894_s21 = smov %s757_s24  ;;  %17 = sbr.rel (!%p15_p2) target bundleno = 3 (0x3), region = 75 }
 0x1ca   :  { %479 = vsyncpa [#allocation3], 1 }
 0x1cb   :  { %481 = vsyncpa [#allocation3 + $0x1], 1 }

</bundles_post_ra>
